<compile_context>
chip_gen: v6e
topology: v6e:2x2x1
jax: 0.10.0
libtpu: 0.0.40
codegen_flags: <defaults>
</compile_context>

<pallas_src>
import jax
import jax.numpy as jnp
from jax.experimental import pallas as pl
from jax.experimental.pallas import tpu as pltpu


def _round_up(x: int, m: int) -> int:
    return ((x + m - 1) // m) * m


def _centerset_kernel(e1_ref, o1_ref, e2_ref, o2_ref,
                      pre_e_ref, pre_o_ref, post_ref, out_ref):
    # Resident weights (constant index_map -> loaded once, reused every step).
    pre_e = pre_e_ref[...]          # (E, mode)
    pre_o = pre_o_ref[...]          # (E, mode)

    # Split-K pre-matmul + ReLU for each branch (no concat, no scratch).
    h1 = jnp.maximum(
        jnp.dot(e1_ref[...], pre_e, preferred_element_type=jnp.float32)
        + jnp.dot(o1_ref[...], pre_o, preferred_element_type=jnp.float32),
        0.0)
    h2 = jnp.maximum(
        jnp.dot(e2_ref[...], pre_e, preferred_element_type=jnp.float32)
        + jnp.dot(o2_ref[...], pre_o, preferred_element_type=jnp.float32),
        0.0)

    # agg_func = torch.min over the branch dimension.
    agg = jnp.minimum(h1, h2)

    # Final matmul against post_mats (unpadded; masked vst is cheaper than
    # doubling output HBM traffic for expand_dims=64).
    out_ref[...] = jnp.dot(
        agg, post_ref[...], preferred_element_type=jnp.float32
    ).astype(out_ref.dtype)


def center_set_forward(embeds1, embeds1_o, embeds2, embeds2_o,
                       pre_mats, post_mats, *, tile_b_max=1024):
    """CenterSet.forward with center_use_offset=True, bn='no', agg=min."""
    B, E = embeds1.shape
    two_e, mode_dims = pre_mats.shape
    assert two_e == 2 * E, "center_use_offset=True expects pre_mats (2E, mode)"
    expand_dims = post_mats.shape[1]

    # Split pre_mats along rows in the wrapper so the kernel never slices or
    # concatenates (the split-K formulation is algebraically identical to
    # concat([e, o]) @ pre_mats).
    pre_e = pre_mats[:E, :]
    pre_o = pre_mats[E:, :]

    # Batch tile: multiple of 8 sublanes, as large as practical (mem-bound).
    tile_b = min(tile_b_max, _round_up(B, 8))
    # v7x megacore: if one tile would cover all of B, split so the grid has
    # >=2 "parallel" steps and both TensorCores get work (free on v5e/v6e).
    if pl.cdiv(B, tile_b) < 2 and B > 16:
        tile_b = max(8, _round_up(pl.cdiv(B, 2), 8))
    grid = (pl.cdiv(B, tile_b),)

    row_spec = pl.BlockSpec((tile_b, E), lambda i: (i, 0))
    pre_spec = pl.BlockSpec((E, mode_dims), lambda i: (0, 0))            # resident
    post_spec = pl.BlockSpec((mode_dims, expand_dims), lambda i: (0, 0))  # resident
    out_spec = pl.BlockSpec((tile_b, expand_dims), lambda i: (i, 0))

    flops = 2 * (2 * B) * two_e * mode_dims + 2 * B * mode_dims * expand_dims
    bytes_accessed = 4 * (4 * B * E                 # four activation inputs
                          + two_e * mode_dims       # pre_mats (split halves)
                          + mode_dims * expand_dims  # post_mats
                          + B * expand_dims)        # output

    out = pl.pallas_call(
        _centerset_kernel,
        out_shape=jax.ShapeDtypeStruct((B, expand_dims), jnp.float32),
        grid=grid,
        in_specs=[row_spec, row_spec, row_spec, row_spec,
                  pre_spec, pre_spec, post_spec],
        out_specs=out_spec,
        compiler_params=pltpu.CompilerParams(
            dimension_semantics=("parallel",),
            vmem_limit_bytes=32 << 20),
        cost_estimate=pl.CostEstimate(flops=flops, transcendentals=0,
                                      bytes_accessed=bytes_accessed),
    )(embeds1, embeds1_o, embeds2, embeds2_o, pre_e, pre_o, post_mats)

    return out


def xavier_uniform(key, shape):
    fan_in, fan_out = shape
    bound = jnp.sqrt(6.0 / (fan_in + fan_out))
    return jax.random.uniform(key, shape, jnp.float32, -bound, bound)


if __name__ == "__main__":
    # Small shapes consistent with the module.
    batch = 8
    mode_dims = 64
    expand_dims = 64           # embeds have `expand_dims` features
    # center_use_offset=True  -> pre_mats: (expand_dims*2, mode_dims)

    key = jax.random.PRNGKey(0)
    k1, k2, k3, k4, kp, kq = jax.random.split(key, 6)

    embeds1 = jax.random.normal(k1, (batch, expand_dims), jnp.float32)
    embeds1_o = jax.random.normal(k2, (batch, expand_dims), jnp.float32)
    embeds2 = jax.random.normal(k3, (batch, expand_dims), jnp.float32)
    embeds2_o = jax.random.normal(k4, (batch, expand_dims), jnp.float32)

    pre_mats = xavier_uniform(kp, (expand_dims * 2, mode_dims))
    post_mats = xavier_uniform(kq, (mode_dims, expand_dims))

    out = center_set_forward(embeds1, embeds1_o, embeds2, embeds2_o,
                             pre_mats, post_mats)
    out = jax.block_until_ready(out)

    # Reference check (pure JAX) to make sure semantics match the torch module.
    t1 = jnp.concatenate([embeds1, embeds1_o], axis=1)
    t2 = jnp.concatenate([embeds2, embeds2_o], axis=1)
    h1 = jnp.maximum(t1 @ pre_mats, 0.0)
    h2 = jnp.maximum(t2 @ pre_mats, 0.0)
    ref = jnp.minimum(h1, h2) @ post_mats
    assert out.shape == (batch, expand_dims)
    assert jnp.allclose(out, ref, atol=1e-5, rtol=1e-5)

    # TODO(synk): bn='before'/'after' (BatchNorm1d) and the optional 3rd
    # branch (embeds3) are not exercised in this synthetic config.
    print("KERNEL_OK")
</pallas_src>

<mosaic_0001>
module attributes {stable_mosaic.version = 11 : i64} {
  func.func @_centerset_kernel(%arg0: i32, %arg1: memref<8x64xf32, #tpu.memory_space<vmem>>, %arg2: memref<8x64xf32, #tpu.memory_space<vmem>>, %arg3: memref<8x64xf32, #tpu.memory_space<vmem>>, %arg4: memref<8x64xf32, #tpu.memory_space<vmem>>, %arg5: memref<64x64xf32, #tpu.memory_space<vmem>>, %arg6: memref<64x64xf32, #tpu.memory_space<vmem>>, %arg7: memref<64x64xf32, #tpu.memory_space<vmem>>, %arg8: memref<8x64xf32, #tpu.memory_space<vmem>>) attributes {dimension_semantics = [#tpu.dimension_semantics<parallel>], iteration_bounds = array<i64: 1>, scalar_prefetch = 0 : i64, scratch_operands = 0 : i64, tpu.core_type = #tpu.core_type<tc>, window_params = [{transform_indices = @transform_0, window_bounds = array<i64: 8, 64>}, {transform_indices = @transform_1, window_bounds = array<i64: 8, 64>}, {transform_indices = @transform_2, window_bounds = array<i64: 8, 64>}, {transform_indices = @transform_3, window_bounds = array<i64: 8, 64>}, {pipeline_mode = #tpu.pipeline_mode<synchronous>, transform_indices = @transform_4, window_bounds = array<i64: 64, 64>}, {pipeline_mode = #tpu.pipeline_mode<synchronous>, transform_indices = @transform_5, window_bounds = array<i64: 64, 64>}, {pipeline_mode = #tpu.pipeline_mode<synchronous>, transform_indices = @transform_6, window_bounds = array<i64: 64, 64>}, {transform_indices = @transform_7, window_bounds = array<i64: 8, 64>}]} {
    %c0 = arith.constant 0 : index
    %c0_0 = arith.constant 0 : index
    %0 = vector.load %arg5[%c0, %c0_0] : memref<64x64xf32, #tpu.memory_space<vmem>>, vector<64x64xf32>
    %c0_1 = arith.constant 0 : index
    %c0_2 = arith.constant 0 : index
    %1 = vector.load %arg6[%c0_1, %c0_2] : memref<64x64xf32, #tpu.memory_space<vmem>>, vector<64x64xf32>
    %c0_3 = arith.constant 0 : index
    %c0_4 = arith.constant 0 : index
    %2 = vector.load %arg1[%c0_3, %c0_4] : memref<8x64xf32, #tpu.memory_space<vmem>>, vector<8x64xf32>
    %cst = arith.constant dense<0.000000e+00> : vector<8x64xf32>
    %3 = tpu.matmul %2, %0, %cst {dimension_numbers = #tpu.dot_dimension_numbers<[1], [0], [0], [1], [0, 0, 1, 1], [], []>} : vector<8x64xf32>, vector<64x64xf32>, vector<8x64xf32> -> vector<8x64xf32>
    %c0_5 = arith.constant 0 : index
    %c0_6 = arith.constant 0 : index
    %4 = vector.load %arg2[%c0_5, %c0_6] : memref<8x64xf32, #tpu.memory_space<vmem>>, vector<8x64xf32>
    %cst_7 = arith.constant dense<0.000000e+00> : vector<8x64xf32>
    %5 = tpu.matmul %4, %1, %cst_7 {dimension_numbers = #tpu.dot_dimension_numbers<[1], [0], [0], [1], [0, 0, 1, 1], [], []>} : vector<8x64xf32>, vector<64x64xf32>, vector<8x64xf32> -> vector<8x64xf32>
    %6 = arith.addf %3, %5 : vector<8x64xf32>
    %cst_8 = arith.constant 0.000000e+00 : f32
    %7 = vector.broadcast %cst_8 : f32 to vector<8x64xf32>
    %8 = arith.maximumf %6, %7 : vector<8x64xf32>
    %c0_9 = arith.constant 0 : index
    %c0_10 = arith.constant 0 : index
    %9 = vector.load %arg3[%c0_9, %c0_10] : memref<8x64xf32, #tpu.memory_space<vmem>>, vector<8x64xf32>
    %cst_11 = arith.constant dense<0.000000e+00> : vector<8x64xf32>
    %10 = tpu.matmul %9, %0, %cst_11 {dimension_numbers = #tpu.dot_dimension_numbers<[1], [0], [0], [1], [0, 0, 1, 1], [], []>} : vector<8x64xf32>, vector<64x64xf32>, vector<8x64xf32> -> vector<8x64xf32>
    %c0_12 = arith.constant 0 : index
    %c0_13 = arith.constant 0 : index
    %11 = vector.load %arg4[%c0_12, %c0_13] : memref<8x64xf32, #tpu.memory_space<vmem>>, vector<8x64xf32>
    %cst_14 = arith.constant dense<0.000000e+00> : vector<8x64xf32>
    %12 = tpu.matmul %11, %1, %cst_14 {dimension_numbers = #tpu.dot_dimension_numbers<[1], [0], [0], [1], [0, 0, 1, 1], [], []>} : vector<8x64xf32>, vector<64x64xf32>, vector<8x64xf32> -> vector<8x64xf32>
    %13 = arith.addf %10, %12 : vector<8x64xf32>
    %cst_15 = arith.constant 0.000000e+00 : f32
    %14 = vector.broadcast %cst_15 : f32 to vector<8x64xf32>
    %15 = arith.maximumf %13, %14 : vector<8x64xf32>
    %16 = arith.minimumf %8, %15 : vector<8x64xf32>
    %c0_16 = arith.constant 0 : index
    %c0_17 = arith.constant 0 : index
    %17 = vector.load %arg7[%c0_16, %c0_17] : memref<64x64xf32, #tpu.memory_space<vmem>>, vector<64x64xf32>
    %cst_18 = arith.constant dense<0.000000e+00> : vector<8x64xf32>
    %18 = tpu.matmul %16, %17, %cst_18 {dimension_numbers = #tpu.dot_dimension_numbers<[1], [0], [0], [1], [0, 0, 1, 1], [], []>} : vector<8x64xf32>, vector<64x64xf32>, vector<8x64xf32> -> vector<8x64xf32>
    %c0_19 = arith.constant 0 : index
    %c0_20 = arith.constant 0 : index
    %19 = vector.load %arg8[%c0_19, %c0_20] : memref<8x64xf32, #tpu.memory_space<vmem>>, vector<8x64xf32>
    tpu.vector_store %arg8[%c0_19, %c0_20], %18 {strides = array<i32>} : memref<8x64xf32, #tpu.memory_space<vmem>>, vector<8x64xf32>,
    return
  }
  func.func @transform_0(%arg0: i32) -> (i32, i32) {
    %c0_i32 = arith.constant 0 : i32
    %c0_i32_0 = arith.constant 0 : i32
    return %arg0, %c0_i32 : i32, i32
  }
  func.func @transform_1(%arg0: i32) -> (i32, i32) {
    %c0_i32 = arith.constant 0 : i32
    %c0_i32_0 = arith.constant 0 : i32
    return %arg0, %c0_i32 : i32, i32
  }
  func.func @transform_2(%arg0: i32) -> (i32, i32) {
    %c0_i32 = arith.constant 0 : i32
    %c0_i32_0 = arith.constant 0 : i32
    return %arg0, %c0_i32 : i32, i32
  }
  func.func @transform_3(%arg0: i32) -> (i32, i32) {
    %c0_i32 = arith.constant 0 : i32
    %c0_i32_0 = arith.constant 0 : i32
    return %arg0, %c0_i32 : i32, i32
  }
  func.func @transform_4(%arg0: i32) -> (i32, i32) {
    %c0_i32 = arith.constant 0 : i32
    %c0_i32_0 = arith.constant 0 : i32
    %c0_i32_1 = arith.constant 0 : i32
    return %c0_i32, %c0_i32_0 : i32, i32
  }
  func.func @transform_5(%arg0: i32) -> (i32, i32) {
    %c0_i32 = arith.constant 0 : i32
    %c0_i32_0 = arith.constant 0 : i32
    %c0_i32_1 = arith.constant 0 : i32
    return %c0_i32, %c0_i32_0 : i32, i32
  }
  func.func @transform_6(%arg0: i32) -> (i32, i32) {
    %c0_i32 = arith.constant 0 : i32
    %c0_i32_0 = arith.constant 0 : i32
    %c0_i32_1 = arith.constant 0 : i32
    return %c0_i32, %c0_i32_0 : i32, i32
  }
  func.func @transform_7(%arg0: i32) -> (i32, i32) {
    %c0_i32 = arith.constant 0 : i32
    %c0_i32_0 = arith.constant 0 : i32
    return %arg0, %c0_i32 : i32, i32
  }
}

</mosaic_0001>

<bundles_post_ra>
// kernel: tpu_custom_call.1
= control target key start
LH: loop header
LB: loop body
LE: loop exit
PB: predicated region body
PF: predicated region fallthrough
CT: control target
= control target key end

     0   :  { %12 = vsyncpa [#allocation3], 0  ;;  %s998_s0 = inlined_call_operand.hbm [shape: f32[8,64], index: 0, kind: input, shape index: {}]   ;;  %s999_s1 = inlined_call_operand.hbm [shape: f32[8,64], index: 1, kind: input, shape index: {}]   ;;  %s1000_s2 = inlined_call_operand.hbm [shape: f32[8,64], index: 2, kind: input, shape index: {}]   ;;  %s1001_s3 = inlined_call_operand.hbm [shape: f32[8,64], index: 3, kind: input, shape index: {}]   ;;  %s1002_s4 = inlined_call_operand.hbm [shape: f32[64,64], index: 4, kind: input, shape index: {}]   ;;  %s1003_s5 = inlined_call_operand.hbm [shape: f32[64,64], index: 5, kind: input, shape index: {}]   ;;  %s1004_s6 = inlined_call_operand.hbm [shape: f32[64,64], index: 6, kind: input, shape index: {}]   ;;  %s1005_s7 = inlined_call_operand.hbm [shape: f32[8,64], index: 7, kind: output, shape index: {}]  }
   0x1   :  { %13 = vsyncpa [#allocation6], 0 }
   0x2   :  { %14 = vsyncpa [#allocation9], 0 }
   0x3   :  { %15 = vsyncpa [#allocation12], 0 }
   0x4   :  { %16 = vsyncpa [#allocation4], 0  ;;  %s857_s24 = smov [#allocation5]   ;;  %s858_s26 = smov [#allocation8]  }
   0x5   :  { %s33_s25 = sshll.u32 %s857_s24, 4  ;;  %s53_s27 = sshll.u32 %s858_s26, 4  ;;  %s34_s25 = int_to_ptr.vmem [resolvable:$true] %s33_s25  ;;  %s54_s27 = int_to_ptr.vmem [resolvable:$true] %s53_s27 }
   0x6   :  { %s695_s28 = scalar_lea.vmem %s34_s25, 128  ;;  %p700_p1 = scmp.lt.s32.totalorder %s34_s25, %s34_s25 }
   0x7   :  { %p696_p0 = scmp.ne.s32.totalorder %s34_s25, %s695_s28  ;;  %p701_p2 = scmp.lt.s32.totalorder %s695_s28, %s695_s28 }
   0x9   :  { %p702_p3 = por %p701_p2, %p700_p1 }
   0xb   :  { %p703_p4 = pnand %p702_p3, %p696_p0 }
   0xd   :  { %706 = shalt.err (!%p703_p4)
}
   0xe   :  { %36 = dma.hbm_to_vmem [thread:$0]  %s999_s1, 128, %s34_s25, [#allocation6]  }
   0xf   :  { %s715_s8 = scalar_lea.vmem %s54_s27, 128  ;;  %p720_p6 = scmp.lt.s32.totalorder %s54_s27, %s54_s27 }
  0x10   :  { %p716_p5 = scmp.ne.s32.totalorder %s54_s27, %s715_s8  ;;  %p721_p7 = scmp.lt.s32.totalorder %s715_s8, %s715_s8 }
  0x12   :  { %p722_p8 = por %p721_p7, %p720_p6 }
  0x14   :  { %p723_p9 = pnand %p722_p8, %p716_p5 }
  0x16   :  { %726 = shalt.err (!%p723_p9)
}
  0x17   :  { %56 = dma.hbm_to_vmem [thread:$0]  %s1001_s3, 128, %s54_s27, [#allocation9]  }
  0x18   :  { %s859_s11 = smov [#allocation11]   ;;  %s860_s13 = smov [#allocation2]  }
  0x19   :  { %s74_s12 = sshll.u32 %s859_s11, 4  ;;  %s23_s14 = sshll.u32 %s860_s13, 4  ;;  %s75_s12 = int_to_ptr.vmem [resolvable:$true] %s74_s12  ;;  %s24_s14 = int_to_ptr.vmem [resolvable:$true] %s23_s14 }
  0x1a   :  { %s735_s15 = scalar_lea.vmem %s75_s12, 1024  ;;  %p740_p11 = scmp.lt.s32.totalorder %s75_s12, %s75_s12 }
  0x1b   :  { %p736_p10 = scmp.ne.s32.totalorder %s75_s12, %s735_s15  ;;  %p741_p12 = scmp.lt.s32.totalorder %s735_s15, %s735_s15 }
  0x1d   :  { %p742_p13 = por %p741_p12, %p740_p11 }
  0x1f   :  { %p743_p0 = pnand %p742_p13, %p736_p10 }
  0x21   :  { %746 = shalt.err (!%p743_p0)
}
  0x22   :  { %s861_s1 = smov 128   ;;  %s862_s16 = smov 8  }
  0x23   :  { %80 = dma.hbm_to_vmem [thread:$0]  %s1003_s5, 1024, %s75_s12, [#allocation12], %s861_s1, %s861_s1, %s862_s16  }
  0x24   :  { %s755_s18 = scalar_lea.vmem %s24_s14, 128  ;;  %p760_p2 = scmp.lt.s32.totalorder %s24_s14, %s24_s14 }
  0x25   :  { %p756_p1 = scmp.ne.s32.totalorder %s24_s14, %s755_s18  ;;  %p761_p3 = scmp.lt.s32.totalorder %s755_s18, %s755_s18 }
  0x27   :  { %p762_p4 = por %p761_p3, %p760_p2 }
  0x29   :  { %p763_p5 = pnand %p762_p4, %p756_p1 }
  0x2b   :  { %766 = shalt.err (!%p763_p5)
}
  0x2c   :  { %26 = dma.hbm_to_vmem [thread:$0]  %s998_s0, 128, %s24_s14, [#allocation3]  }
  0x2d   :  { %s863_s21 = smov [#allocation7]   ;;  %s864_s23 = smov [#allocation10]  }
  0x2e   :  { %s43_s22 = sshll.u32 %s863_s21, 4  ;;  %s62_s24 = sshll.u32 %s864_s23, 4  ;;  %s44_s22 = int_to_ptr.vmem [resolvable:$true] %s43_s22  ;;  %s63_s24 = int_to_ptr.vmem [resolvable:$true] %s62_s24 }
  0x2f   :  { %s775_s25 = scalar_lea.vmem %s44_s22, 128  ;;  %p780_p7 = scmp.lt.s32.totalorder %s44_s22, %s44_s22 }
  0x30   :  { %p776_p6 = scmp.ne.s32.totalorder %s44_s22, %s775_s25  ;;  %p781_p8 = scmp.lt.s32.totalorder %s775_s25, %s775_s25 }
  0x32   :  { %p782_p9 = por %p781_p8, %p780_p7 }
  0x34   :  { %p783_p10 = pnand %p782_p9, %p776_p6 }
  0x36   :  { %786 = shalt.err (!%p783_p10)
}
  0x37   :  { %46 = dma.hbm_to_vmem [thread:$0]  %s1000_s2, 128, %s44_s22, [#allocation6]  }
  0x38   :  { %s795_s27 = scalar_lea.vmem %s63_s24, 1024  ;;  %p800_p12 = scmp.lt.s32.totalorder %s63_s24, %s63_s24 }
  0x39   :  { %p796_p11 = scmp.ne.s32.totalorder %s63_s24, %s795_s27  ;;  %p801_p13 = scmp.lt.s32.totalorder %s795_s27, %s795_s27 }
  0x3b   :  { %p802_p0 = por %p801_p13, %p800_p12 }
  0x3d   :  { %p803_p1 = pnand %p802_p0, %p796_p11 }
  0x3f   :  { %806 = shalt.err (!%p803_p1)
}
  0x40   :  { %68 = dma.hbm_to_vmem [thread:$0]  %s1002_s4, 1024, %s63_s24, [#allocation9], %s861_s1, %s861_s1, %s862_s16  }
  0x41   :  { %s865_s29 = smov [#allocation13]  }
  0x42   :  { %s86_s30 = sshll.u32 %s865_s29, 4  ;;  %s87_s30 = int_to_ptr.vmem [resolvable:$true] %s86_s30 }
  0x43   :  { %s815_s8 = scalar_lea.vmem %s87_s30, 1024  ;;  %p820_p3 = scmp.lt.s32.totalorder %s87_s30, %s87_s30 }
  0x44   :  { %p816_p2 = scmp.ne.s32.totalorder %s87_s30, %s815_s8  ;;  %p821_p4 = scmp.lt.s32.totalorder %s815_s8, %s815_s8 }
  0x46   :  { %p822_p5 = por %p821_p4, %p820_p3 }
  0x48   :  { %p823_p6 = pnand %p822_p5, %p816_p2 }
  0x4a   :  { %826 = shalt.err (!%p823_p6)
}
  0x4b   :  { %92 = dma.hbm_to_vmem [thread:$0]  %s1004_s6, 1024, %s87_s30, [#allocation12], %s861_s1, %s861_s1, %s862_s16  }
  0x4c   :  { %847 = dma.done.wait [#allocation3], 128  }
  0x4d   :  { %848 = vsyncadd [#allocation3], 4294967168 }
  0x4e   :  { %849 = dma.done.wait [#allocation6], 256  }
  0x4f   :  { %850 = vsyncadd [#allocation6], 4294967040 }
  0x50   :  { %851 = dma.done.wait [#allocation9], 1152  }
  0x51   :  { %852 = vsyncadd [#allocation9], 4294966144 }
  0x52   :  { %853 = dma.done.wait [#allocation12], 2048  }
  0x53   :  { %854 = vsyncadd [#allocation12], 4294965248  ;;  %v866_v0 = vmov 0.0   ;;  %vm867_vm0 = vmmov 0   ;;  %v129_v1 = vld [vmem:[#allocation11 + $0x38] sm:$0xff]  ;;  %v128_v3 = vld [vmem:[#allocation11 + $0x30] sm:$0xff] }
  0x54   :  { %580 = vmatprep.subr.mxu0 %v866_v0  ;;  %599 = vmatprep.subr.mxu1 %v866_v0  ;;  %v121_v2 = vld [vmem:[#allocation10 + $0x38] sm:$0xff]  ;;  %v120_v4 = vld [vmem:[#allocation10 + $0x30] sm:$0xff]  ;;  %v127_v5 = vld [vmem:[#allocation11 + $0x28] sm:$0xff]  ;;  %vm132_vm1 = vcmask 523264   ;;  %s868_s4 = smov [#allocation14]  }
  0x55   :  { %596 = vmatprep.mubr.msk.f32.mxu0 %vm867_vm0, %v866_v0  ;;  %615 = vmatprep.mubr.msk.f32.mxu1 %vm867_vm0, %v866_v0  ;;  %v119_v6 = vld [vmem:[#allocation10 + $0x28] sm:$0xff]  ;;  %v126_v7 = vld [vmem:[#allocation11 + $0x20] sm:$0xff]  ;;  %v125_v9 = vld [vmem:[#allocation11 + $0x18] sm:$0xff]  ;;  %s518_s6 = sshll.u32 %s868_s4, 4  ;;  %s519_s6 = int_to_ptr.vmem [resolvable:$true] %s518_s6 }
  0x56   :  { %581 = vmatpush3.msra.mxu0 %v129_v1  ;;  %600 = vmatpush3.msra.mxu1 %v121_v2  ;;  %v118_v8 = vld [vmem:[#allocation10 + $0x20] sm:$0xff]  ;;  %v117_v10 = vld [vmem:[#allocation10 + $0x18] sm:$0xff]  ;;  %v124_v11 = vld [vmem:[#allocation11 + $0x10] sm:$0xff]  ;;  %s827_s10 = scalar_lea.vmem %s519_s6, 128  ;;  %p832_p8 = scmp.lt.s32.totalorder %s519_s6, %s519_s6 }
  0x57   :  { %582 = vmatprep.subr.mxu0 %v866_v0  ;;  %601 = vmatprep.subr.mxu1 %v866_v0  ;;  %v116_v12 = vld [vmem:[#allocation10 + $0x10] sm:$0xff]  ;;  %v123_v13 = vld [vmem:[#allocation11 + $0x8] sm:$0xff]  ;;  %v122_v15 = vld [vmem:[#allocation11] sm:$0xff]  ;;  %p828_p7 = scmp.ne.s32.totalorder %s519_s6, %s827_s10  ;;  %p833_p9 = scmp.lt.s32.totalorder %s827_s10, %s827_s10 }
  0x58   :  { %583 = vmatpush3.msra.mxu0 %v128_v3  ;;  %602 = vmatpush3.msra.mxu1 %v120_v4  ;;  %v115_v14 = vld [vmem:[#allocation10 + $0x8] sm:$0xff]  ;;  %v114_v16 = vld [vmem:[#allocation10] sm:$0xff]  ;;  %v281_v19 = vld [vmem:[#allocation8] sm:$0xff] }
  0x59   :  { %584 = vmatprep.subr.mxu0 %v866_v0  ;;  %603 = vmatprep.subr.mxu1 %v866_v0  ;;  %v131_v17 = vld [vmem:[#allocation5] sm:$0xff]  ;;  %v130_v18 = vld [vmem:[#allocation2] sm:$0xff]  ;;  %v280_v20 = vld [vmem:[#allocation7] sm:$0xff]  ;;  %p834_p10 = por %p833_p9, %p832_p8 }
  0x5a   :  { %585 = vmatpush3.msra.mxu0 %v127_v5  ;;  %604 = vmatpush3.msra.mxu1 %v119_v6  ;;  %v437_v21 = vld [vmem:[#allocation13 + $0x38] sm:$0xff]  ;;  %v436_v22 = vld [vmem:[#allocation13 + $0x30] sm:$0xff]  ;;  %v435_v23 = vld [vmem:[#allocation13 + $0x28] sm:$0xff] }
  0x5b   :  { %586 = vmatprep.subr.mxu0 %v866_v0  ;;  %605 = vmatprep.subr.mxu1 %v866_v0  ;;  %v434_v24 = vld [vmem:[#allocation13 + $0x20] sm:$0xff]  ;;  %v433_v25 = vld [vmem:[#allocation13 + $0x18] sm:$0xff]  ;;  %v432_v26 = vld [vmem:[#allocation13 + $0x10] sm:$0xff]  ;;  %p835_p11 = pnand %p834_p10, %p828_p7 }
  0x5c   :  { %587 = vmatpush3.msra.mxu0 %v126_v7  ;;  %606 = vmatpush3.msra.mxu1 %v118_v8  ;;  %v431_v27 = vld [vmem:[#allocation13 + $0x8] sm:$0xff]  ;;  %v430_v28 = vld [vmem:[#allocation13] sm:$0xff] }
  0x5d   :  { %588 = vmatprep.subr.mxu0 %v866_v0  ;;  %607 = vmatprep.subr.mxu1 %v866_v0 }
  0x5e   :  { %589 = vmatpush3.msra.mxu0 %v125_v9  ;;  %608 = vmatpush3.msra.mxu1 %v117_v10 }
  0x5f   :  { %590 = vmatprep.subr.mxu0 %v866_v0  ;;  %609 = vmatprep.subr.mxu1 %v866_v0 }
  0x60   :  { %591 = vmatpush3.msra.mxu0 %v124_v11  ;;  %610 = vmatpush3.msra.mxu1 %v116_v12 }
  0x61   :  { %592 = vmatprep.subr.mxu0 %v866_v0  ;;  %611 = vmatprep.subr.mxu1 %v866_v0 }
  0x62   :  { %593 = vmatpush3.msra.mxu0 %v123_v13  ;;  %612 = vmatpush3.msra.mxu1 %v115_v14 }
  0x63   :  { %594 = vmatprep.subr.mxu0 %v866_v0  ;;  %613 = vmatprep.subr.mxu1 %v866_v0 }
  0x64   :  { %595 = vmatpush3.msra.mxu0 %v122_v15  ;;  %614 = vmatpush3.msra.mxu1 %v114_v16 }
  0x65   :  { %597 = vmatmul.mubr.msk.f32.vlgmr.msra.gmra.mxu0 %vm132_vm1, %v131_v17  ;;  %616 = vmatmul.mubr.msk.f32.vlgmr.msra.gmra.mxu1 %vm132_vm1, %v130_v18 }
  0x66   :  { %618 = vmatprep.subr.mxu0 %v866_v0  ;;  %637 = vmatprep.subr.mxu1 %v866_v0 }
  0x67   :  { %619 = vmatpush3.msra.mxu0 %v129_v1  ;;  %638 = vmatpush3.msra.mxu1 %v121_v2 }
  0x68   :  { %620 = vmatprep.subr.mxu0 %v866_v0  ;;  %639 = vmatprep.subr.mxu1 %v866_v0 }
  0x69   :  { %621 = vmatpush3.msra.mxu0 %v128_v3  ;;  %640 = vmatpush3.msra.mxu1 %v120_v4 }
  0x6a   :  { %622 = vmatprep.subr.mxu0 %v866_v0  ;;  %641 = vmatprep.subr.mxu1 %v866_v0 }
  0x6b   :  { %623 = vmatpush3.msra.mxu0 %v127_v5  ;;  %642 = vmatpush3.msra.mxu1 %v119_v6 }
  0x6c   :  { %624 = vmatprep.subr.mxu0 %v866_v0  ;;  %643 = vmatprep.subr.mxu1 %v866_v0 }
  0x6d   :  { %625 = vmatpush3.msra.mxu0 %v126_v7  ;;  %644 = vmatpush3.msra.mxu1 %v118_v8 }
  0x6e   :  { %626 = vmatprep.subr.mxu0 %v866_v0  ;;  %645 = vmatprep.subr.mxu1 %v866_v0 }
  0x6f   :  { %627 = vmatpush3.msra.mxu0 %v125_v9  ;;  %646 = vmatpush3.msra.mxu1 %v117_v10 }
  0x70   :  { %628 = vmatprep.subr.mxu0 %v866_v0  ;;  %647 = vmatprep.subr.mxu1 %v866_v0 }
  0x71   :  { %629 = vmatpush3.msra.mxu0 %v124_v11  ;;  %648 = vmatpush3.msra.mxu1 %v116_v12 }
  0x72   :  { %630 = vmatprep.subr.mxu0 %v866_v0  ;;  %649 = vmatprep.subr.mxu1 %v866_v0 }
  0x73   :  { %631 = vmatpush3.msra.mxu0 %v123_v13  ;;  %650 = vmatpush3.msra.mxu1 %v115_v14 }
  0x74   :  { %632 = vmatprep.subr.mxu0 %v866_v0  ;;  %651 = vmatprep.subr.mxu1 %v866_v0 }
  0x75   :  { %633 = vmatpush3.msra.mxu0 %v122_v15  ;;  %634 = vmatprep.mubr.msk.f32.mxu0 %vm867_vm0, %v866_v0 }
  0x76   :  { %652 = vmatpush3.msra.mxu1 %v114_v16  ;;  %653 = vmatprep.mubr.msk.f32.mxu1 %vm867_vm0, %v866_v0 }
  0x77   :  { %635 = vmatmul.mubr.msk.f32.vlgmr.msra.gmra.mxu0 %vm132_vm1, %v281_v19  ;;  %654 = vmatmul.mubr.msk.f32.vlgmr.msra.gmra.mxu1 %vm132_vm1, %v280_v20 }
  0x78   :  { %656 = vmatprep.subr.mxu0 %v866_v0  ;;  %672 = vmatprep.mubr.msk.f32.mxu0 %vm867_vm0, %v866_v0 }
  0x79   :  { %657 = vmatpush3.msra.mxu0 %v437_v21 }
  0x7a   :  { %658 = vmatprep.subr.mxu0 %v866_v0 }
  0x7b   :  { %659 = vmatpush3.msra.mxu0 %v436_v22 }
  0x7c   :  { %660 = vmatprep.subr.mxu0 %v866_v0 }
  0x7d   :  { %661 = vmatpush3.msra.mxu0 %v435_v23 }
  0x7e   :  { %662 = vmatprep.subr.mxu0 %v866_v0 }
  0x7f   :  { %663 = vmatpush3.msra.mxu0 %v434_v24 }
  0x80   :  { %664 = vmatprep.subr.mxu0 %v866_v0 }
  0x81   :  { %665 = vmatpush3.msra.mxu0 %v433_v25 }
  0x82   :  { %666 = vmatprep.subr.mxu0 %v866_v0 }
  0x83   :  { %667 = vmatpush3.msra.mxu0 %v432_v26 }
  0x84   :  { %668 = vmatprep.subr.mxu0 %v866_v0 }
  0x85   :  { %669 = vmatpush3.msra.mxu0 %v431_v27 }
  0x86   :  { %670 = vmatprep.subr.mxu0 %v866_v0 }
  0x87   :  { %671 = vmatpush3.msra.mxu0 %v430_v28 }
 0x125   :  { %v202_v29 = vpop.f32.mrf.mxu0  ;;  %v275_v30 = vpop.f32.mrf.mxu1 }
 0x126   :  { %v276_v33 = vadd.f32 %v275_v30, %v202_v29 }
 0x127   :  { %v598_v31 = vpop.f32.mrf.mxu0  ;;  %v617_v32 = vpop.f32.mrf.mxu1 }
 0x128   :  { %v279_v39 = vmax.f32 %v276_v33, 0.0 }
 0x137   :  { %v351_v34 = vpop.f32.mrf.mxu0  ;;  %v424_v35 = vpop.f32.mrf.mxu1 }
 0x138   :  { %v425_v36 = vadd.f32 %v424_v35, %v351_v34 }
 0x139   :  { %v636_v37 = vpop.f32.mrf.mxu0  ;;  %v655_v38 = vpop.f32.mrf.mxu1 }
 0x13a   :  { %v428_v40 = vmax.f32 %v425_v36, 0.0 }
 0x13c   :  { %v429_v41 = vmin.f32 %v279_v39, %v428_v40 }
 0x13e   :  { %673 = vmatmul.mubr.msk.f32.vlgmr.msra.gmra.mxu0 %vm132_vm1, %v429_v41 }
 0x1fe   :  { %v507_v42 = vpop.f32.mrf.mxu0 }
 0x1ff   :  { %511 = vst.msk [vmem:[#allocation14] sm:$0xff] %vm132_vm1, %v507_v42 }
 0x200   :  { %v674_v43 = vpop.f32.mrf.mxu0 }
 0x201   :  { %838 = shalt.err (!%p835_p11)
}
 0x202   :  { %521 = dma.vmem_to_hbm [thread:$0]  %s519_s6, 128, %s1005_s7, [#allocation4]  }
 0x203   :  { %855 = dma.done.wait [#allocation4], 128  }
 0x204   :  { %856 = vsyncadd [#allocation4], 4294967168 }
 0x205   :  { %525 = vsyncpa [#allocation3], 1 }
 0x206   :  { %526 = vsyncpa [#allocation6], 1 }
 0x207   :  { %527 = vsyncpa [#allocation9], 1 }
 0x208   :  { %528 = vsyncpa [#allocation12], 1 }
 0x209   :  { %529 = vsyncpa [#allocation4], 1 }

</bundles_post_ra>
